<compile_context>
chip_gen: v6e
topology: v6e:2x2x1
jax: 0.10.0
libtpu: 0.0.40
codegen_flags: <defaults>
</compile_context>

<pallas_src>
import functools

import jax
import jax.numpy as jnp
from jax.experimental import pallas as pl
from jax.experimental.pallas import tpu as pltpu


def _round_up(x, m):
    return ((x + m - 1) // m) * m


def _cdiv(a, b):
    return (a + b - 1) // b


def _vmem_capacity_bytes():
    # Per-core VMEM; fall back to the smallest production part (v7x: 64 MiB).
    try:
        return int(pltpu.get_tpu_info().vmem_capacity_bytes)
    except Exception:
        return 64 << 20


def _resident_spec(block_shape, index_map):
    # Constant index_map => the block never changes across grid steps; request a
    # single buffer so the resident weight/bias don't pay the 2x double-buffer
    # VMEM tax (matters at ViT-L/H scale on v7x's 64 MiB VMEM).
    buffered = getattr(pl, "Buffered", None)
    if buffered is not None:
        try:
            return pl.BlockSpec(block_shape, index_map, pipeline_mode=buffered(1))
        except TypeError:
            pass
    return pl.BlockSpec(block_shape, index_map)


def _patch_embed_kernel(p_ref, w_ref, b_ref, o_ref):
    # p_ref: [TM, Kp] streamed patch tile
    # w_ref: [Kp, Ep] resident weight;  b_ref: [1, Ep] resident f32 bias
    # o_ref: [TM, Ep]
    acc = jnp.dot(p_ref[...], w_ref[...], preferred_element_type=jnp.float32)
    o_ref[...] = (acc + b_ref[...]).astype(o_ref.dtype)


@functools.partial(
    jax.jit,
    static_argnames=("patch_size", "tm", "mxu_dtype", "out_dtype", "out_layout"))
def patch_embed(x, weight, bias, patch_size, *, tm=None,
                mxu_dtype=jnp.bfloat16, out_dtype=None, out_layout="NLC"):
    """Stride==kernel Conv2d as a patch-wise linear projection on the MXU.

    x: (B, C, H, W); weight: (E, C, p, p); bias: (E,).
    out_layout: "NLC" -> (B, Hp*Wp, E) tokens (default, no output transpose),
                "NHWC" -> (B, Hp, Wp, E), "NCHW" -> (B, E, Hp, Wp) (Conv2d layout).
    mxu_dtype: MXU operand dtype (bf16 default, f32 accumulation; None = x.dtype).
    """
    B, C, H, W = x.shape
    E = weight.shape[0]
    p = patch_size
    assert H % p == 0 and W % p == 0, "H and W must be multiples of patch_size"
    Hp, Wp = H // p, W // p
    M, K = B * Hp * Wp, C * p * p

    compute_dtype = jnp.dtype(mxu_dtype) if mxu_dtype is not None else jnp.dtype(x.dtype)
    out_dt = jnp.dtype(out_dtype) if out_dtype is not None else jnp.dtype(x.dtype)
    in_bs = compute_dtype.itemsize
    out_bs = out_dt.itemsize

    # --- glue: im2col with (c, ph, pw) ordering to match Conv2d's (E,C,p,p)
    # weight flattening. allow_input_fusion below lets XLA fuse this
    # transpose/pad/cast into the kernel's input DMA.
    patches = x.reshape(B, C, Hp, p, Wp, p).transpose(0, 2, 4, 1, 3, 5)
    patches = patches.reshape(M, K).astype(compute_dtype)
    w_mat = weight.reshape(E, K).T.astype(compute_dtype)          # (K, E)

    # --- alignment: lane-dense K/E.
    Kp = _round_up(K, 128)
    Ep = _round_up(E, 128)
    Mp0 = _round_up(M, 8)

    # --- tile sizing from the real VMEM footprint.
    vmem_cap = _vmem_capacity_bytes()
    cap = min(int(0.85 * vmem_cap), vmem_cap - (8 << 20))   # compiler-scratch headroom
    resident = Kp * Ep * in_bs + Ep * 4                      # single-buffered weight+bias
    per_row = 2 * Kp * in_bs + 2 * Ep * out_bs               # double-buffered in/out tiles
    tm_fit = max(((cap - resident) // per_row) // 8 * 8, 8)
    tm_target = tm if tm is not None else (4096 if in_bs <= 2 else 2048)
    TM = max(min(tm_target, tm_fit, Mp0), 8)
    # Keep >= ~8 grid steps so v7x's two TensorCores each get >= 4 steps and the
    # patch-tile double buffer reaches steady state.
    TM = min(TM, _round_up(_cdiv(Mp0, 8), 8))
    TM = max((TM // 8) * 8, 8)

    Mp = _round_up(M, TM)                 # TM divides Mp -> no masked stores
    grid = (Mp // TM,)

    patches = jnp.pad(patches, ((0, Mp - M), (0, Kp - K)))
    w_pad = jnp.pad(w_mat, ((0, Kp - K), (0, Ep - E)))
    b_pad = jnp.pad(bias.astype(jnp.float32), (0, Ep - E)).reshape(1, Ep)

    # True VMEM footprint (no double counting), generous 25% slack, capped below
    # the per-core capacity.
    need = (2 * TM * Kp * in_bs          # streamed patch tile (double-buffered)
            + 2 * TM * Ep * out_bs       # output tile (double-buffered)
            + Kp * Ep * in_bs            # resident weight (single-buffered)
            + 2 * Ep * 4)                # bias + slack
    vmem_limit = int(min(max(int(1.25 * need), 32 << 20), cap))

    cost = pl.CostEstimate(
        flops=2 * M * K * E,
        transcendentals=0,
        bytes_accessed=Mp * Kp * in_bs + Kp * Ep * in_bs + Mp * Ep * out_bs,
    )

    out_flat = pl.pallas_call(
        _patch_embed_kernel,
        out_shape=jax.ShapeDtypeStruct((Mp, Ep), out_dt),
        grid=grid,
        in_specs=[
            pl.BlockSpec((TM, Kp), lambda i: (i, 0)),      # streamed patch tile
            _resident_spec((Kp, Ep), lambda i: (0, 0)),    # resident weight
            _resident_spec((1, Ep), lambda i: (0, 0)),     # resident bias
        ],
        out_specs=pl.BlockSpec((TM, Ep), lambda i: (i, 0)),
        compiler_params=pltpu.CompilerParams(
            dimension_semantics=("parallel",),
            vmem_limit_bytes=vmem_limit,
            allow_input_fusion=[True, False, False],
        ),
        cost_estimate=cost,
    )(patches, w_pad, b_pad)

    # --- strip padding; default layout is lane-dense tokens (no transpose).
    out = out_flat[:M, :E].reshape(B, Hp, Wp, E)
    if out_layout == "NLC":
        return out.reshape(B, Hp * Wp, E)
    if out_layout == "NHWC":
        return out
    if out_layout == "NCHW":
        return out.transpose(0, 3, 1, 2)
    raise ValueError(f"unknown out_layout: {out_layout}")


def _reference(x, weight, bias, patch_size):
    # Pure-JAX reference: strided conv via lax.conv_general_dilated (NCHW / OIHW).
    out = jax.lax.conv_general_dilated(
        x, weight,
        window_strides=(patch_size, patch_size),
        padding="VALID",
        dimension_numbers=("NCHW", "OIHW", "NCHW"),
    )
    return out + bias.reshape(1, -1, 1, 1)


if __name__ == "__main__":
    # Small shapes consistent with the module: B=2, C=4, H=W=16, patch=4, E=32.
    B, C, H, W = 2, 4, 16, 16
    patch_size = 4
    embed_dim = 32

    key = jax.random.PRNGKey(0)
    kx, kw, kb = jax.random.split(key, 3)

    x = jax.random.normal(kx, (B, C, H, W), dtype=jnp.float32)
    weight = 0.02 * jax.random.normal(
        kw, (embed_dim, C, patch_size, patch_size), dtype=jnp.float32)
    bias = 0.02 * jax.random.normal(kb, (embed_dim,), dtype=jnp.float32)

    Hp, Wp = H // patch_size, W // patch_size
    ref = _reference(x, weight, bias, patch_size)           # (B, E, Hp, Wp), f32

    # 1) Default fast path: bf16 MXU operands, token layout (B, N, E).
    tok = jax.block_until_ready(patch_embed(x, weight, bias, patch_size))
    ref_tok = jnp.transpose(ref, (0, 2, 3, 1)).reshape(B, Hp * Wp, embed_dim)
    assert tok.shape == (B, Hp * Wp, embed_dim), tok.shape
    assert jnp.allclose(tok, ref_tok, atol=2e-2, rtol=2e-2), \
        float(jnp.max(jnp.abs(tok - ref_tok)))

    # 2) Bit-tight f32 check in the original nn.Conv2d NCHW layout.
    out = jax.block_until_ready(
        patch_embed(x, weight, bias, patch_size,
                    mxu_dtype=jnp.float32, out_layout="NCHW"))
    assert out.shape == (B, embed_dim, Hp, Wp), out.shape
    assert jnp.allclose(out, ref, atol=1e-5, rtol=1e-5), \
        float(jnp.max(jnp.abs(out - ref)))

    print("KERNEL_OK")
</pallas_src>

<mosaic_0001>
module attributes {stable_mosaic.version = 11 : i64} {
  func.func @_patch_embed_kernel(%arg0: i32, %arg1: memref<8x128xbf16, #tpu.memory_space<vmem>>, %arg2: memref<128x128xbf16, #tpu.memory_space<vmem>>, %arg3: memref<1x128xf32, #tpu.memory_space<vmem>>, %arg4: memref<8x128xf32, #tpu.memory_space<vmem>>) attributes {dimension_semantics = [#tpu.dimension_semantics<parallel>], iteration_bounds = array<i64: 4>, scalar_prefetch = 0 : i64, scratch_operands = 0 : i64, tpu.core_type = #tpu.core_type<tc>, window_params = [{transform_indices = @transform_0, window_bounds = array<i64: 8, 128>}, {pipeline_mode = #tpu.pipeline_mode<synchronous>, transform_indices = @transform_1, window_bounds = array<i64: 128, 128>}, {pipeline_mode = #tpu.pipeline_mode<synchronous>, transform_indices = @transform_2, window_bounds = array<i64: 1, 128>}, {transform_indices = @transform_3, window_bounds = array<i64: 8, 128>}]} {
    %c0 = arith.constant 0 : index
    %c0_0 = arith.constant 0 : index
    %0 = vector.load %arg1[%c0, %c0_0] : memref<8x128xbf16, #tpu.memory_space<vmem>>, vector<8x128xbf16>
    %c0_1 = arith.constant 0 : index
    %c0_2 = arith.constant 0 : index
    %1 = vector.load %arg2[%c0_1, %c0_2] : memref<128x128xbf16, #tpu.memory_space<vmem>>, vector<128x128xbf16>
    %cst = arith.constant dense<0.000000e+00> : vector<8x128xf32>
    %2 = tpu.matmul %0, %1, %cst {dimension_numbers = #tpu.dot_dimension_numbers<[1], [0], [0], [1], [0, 0, 1, 1], [], []>} : vector<8x128xbf16>, vector<128x128xbf16>, vector<8x128xf32> -> vector<8x128xf32>
    %c0_3 = arith.constant 0 : index
    %c0_4 = arith.constant 0 : index
    %3 = vector.load %arg3[%c0_3, %c0_4] : memref<1x128xf32, #tpu.memory_space<vmem>>, vector<1x128xf32>
    %4 = vector.broadcast %3 : vector<1x128xf32> to vector<8x128xf32>
    %5 = arith.addf %2, %4 : vector<8x128xf32>
    %c0_5 = arith.constant 0 : index
    %c0_6 = arith.constant 0 : index
    %6 = vector.load %arg4[%c0_5, %c0_6] : memref<8x128xf32, #tpu.memory_space<vmem>>, vector<8x128xf32>
    tpu.vector_store %arg4[%c0_5, %c0_6], %5 {strides = array<i32>} : memref<8x128xf32, #tpu.memory_space<vmem>>, vector<8x128xf32>,
    return
  }
  func.func @transform_0(%arg0: i32) -> (i32, i32) {
    %c0_i32 = arith.constant 0 : i32
    %c0_i32_0 = arith.constant 0 : i32
    return %arg0, %c0_i32 : i32, i32
  }
  func.func @transform_1(%arg0: i32) -> (i32, i32) {
    %c0_i32 = arith.constant 0 : i32
    %c0_i32_0 = arith.constant 0 : i32
    %c0_i32_1 = arith.constant 0 : i32
    return %c0_i32, %c0_i32_0 : i32, i32
  }
  func.func @transform_2(%arg0: i32) -> (i32, i32) {
    %c0_i32 = arith.constant 0 : i32
    %c0_i32_0 = arith.constant 0 : i32
    %c0_i32_1 = arith.constant 0 : i32
    return %c0_i32, %c0_i32_0 : i32, i32
  }
  func.func @transform_3(%arg0: i32) -> (i32, i32) {
    %c0_i32 = arith.constant 0 : i32
    %c0_i32_0 = arith.constant 0 : i32
    return %arg0, %c0_i32 : i32, i32
  }
}

</mosaic_0001>

<bundles_post_ra>
// kernel: patch_embed.2
= control target key start
LH: loop header
LB: loop body
LE: loop exit
PB: predicated region body
PF: predicated region fallthrough
CT: control target
= control target key end

     0   :  { %s699_s0 = inlined_call_operand.vmem [shape: bf16[128,128], index: 0, kind: input, shape index: {}]   ;;  %s700_s1 = inlined_call_operand.vmem [shape: f32[1,128], index: 1, kind: input, shape index: {}]   ;;  %s701_s2 = inlined_call_operand.vmem [shape: bf16[32,64], index: 2, kind: input, shape index: {}]   ;;  %s702_s3 = inlined_call_operand.<no memory space> [shape: bf16[], index: 3, kind: input, shape index: {}]   ;;  %s703_s4 = inlined_call_operand.hbm [shape: f32[32,128], index: 4, kind: output, shape index: {}]  }
   0x1   :  { %v9_v0 = vstv %s702_s3 }
   0x2   :  { %v570_v1 = vunpack.i.l.bf16 %v9_v0 }
   0x3   :  { %14 = vsyncpa [#allocation8], 0 }
   0x4   :  { %16 = vsyncpa [#allocation8 + $0x1], 0  ;;  %s572_s17 = smov 0   ;;  %s574_s18 = smov 0  }
   0x5   :  { %s576_s19 = smov 0   ;;  %s578_s20 = smov 0  }
   0x6 LB: > { %s593_s3 = sadd.s32 4294967295, %s537_s20   ;;  %s380_s21 = sadd.s32 4294967294, %s537_s20   ;;  %s537_s20 = sphi %s578_s20, %s709_s20   ;;  %s533_s19 = sphi %s576_s19, %s708_s19   ;;  %s529_s18 = sphi %s574_s18, %s707_s18   ;;  %s525_s17 = sphi %s572_s17, %s706_s17  }
   0x7   : > { %s597_s22 = sadd.s32 1, %s537_s20   ;;  %s97_s23 = sadd.s32 1, %s533_s19 }
   0x8   : > { %s94_s24 = ssub.s32 %s537_s20, %s597_s22  ;;  %p107_p0 = scmp.ne.s32.totalorder %s533_s19, %s529_s18 }
   0x9   : > { %p95_p1 = scmp.eq.s32.totalorder %s94_s24, 0  ;;  %p108_p2 = scmp.eq.s32.totalorder %s593_s3, 3 }
   0xa   : > { %p113_p3 = scmp.ne.s32.totalorder %s529_s18, %s525_s17  ;;  %p114_p4 = scmp.eq.s32.totalorder %s380_s21, 3 }
   0xb   : > { %s608_s25 = scalar_select %p95_p1, %s533_s19, %s97_s23  }
   0xc   : > { %p610_p5 = por %p108_p2, %p107_p0  ;;  %p614_p6 = por %p114_p4, %p113_p3 }
   0xd   : > { %p383_p7 = scmp.ge.s32.totalorder %s537_s20, 1  ;;  %p145_p8 = scmp.lt.s32.totalorder %s537_s20, 5 }
   0xf   : > { %p146_p9 = pnand %p383_p7, %p145_p8 }
  0x11   : > { %149 = sbr.rel (%p146_p9) target bundleno = 264 (0x108), region = 32 }
  0x16   : > { %v469_v2 = vld [vmem:[%s699_s0 + $0x38] sm:$0xff]   ;;  %v184_v3 = vlaneseq  ;;  %v539_v4 = vmov 0.0   ;;  %v470_v5 = vld [vmem:[%s699_s0 + $0x30] sm:$0xff]   ;;  %vm540_vm0 = vmmov 0   ;;  %p168_p10 = scmp.lt.s32.totalorder %s593_s3, 3  ;;  %v471_v7 = vld [vmem:[%s699_s0 + $0x28] sm:$0xff]  }
  0x17   : > { %408 = vmatprep.subr.bf16.mxu0 %v539_v4  ;;  %424 = vmatprep.mubr.msk.bf16.mxu0 %vm540_vm0, %v539_v4  ;;  %v472_v10 = vld [vmem:[%s699_s0 + $0x20] sm:$0xff]   ;;  %v473_v13 = vld [vmem:[%s699_s0 + $0x18] sm:$0xff]   ;;  %v474_v14 = vld [vmem:[%s699_s0 + $0x10] sm:$0xff]   ;;  %s165_s5 = sand.u32 1, %s529_s18  }
  0x18   : > { %409 = vmatpush3.bf16.msra.mxu0 %v469_v2  ;;  %s169_s6 = scalar_select %p168_p10, %s593_s3, 3  ;;  %v185_v6 = vand.u32 127, %v184_v3  ;;  %v475_v15 = vld [vmem:[%s699_s0 + $0x8] sm:$0xff]   ;;  %v476_v16 = vld [vmem:[%s699_s0] sm:$0xff]  }
  0x19   : > { %410 = vmatprep.subr.bf16.mxu0 %v539_v4  ;;  %v386_v18 = vld [vmem:[%s700_s1] ss:$0 sm:$0xff]  ;;  %s308_s15 = scalar_lea.sflag [#allocation8], %s165_s5 }
  0x1a   : > { %s385_s9 = sshll.u32 %s169_s6, 2  ;;  %vm187_vm1 = vcmp.lt.s32.totalorder %v185_v6, 64  ;;  %s384_s6 = sshll.u32 %s165_s5, 3 }
  0x1b   : > { %s171_s12 = scalar_lea.vmem %s701_s2, %s385_s9  ;;  %s396_s9 = sshll.u32 %s593_s3, 7 }
  0x1c   : > { %411 = vmatpush3.bf16.msra.mxu0 %v470_v5  ;;  %v181_v8 = vld [vmem:[%s171_s12] sm:$0xf]  ;;  %s167_s10 = scalar_lea.vmem [#allocation7], %s384_s6  ;;  %s658_s14 = scalar_lea.hbm %s703_s4, %s396_s9 }
  0x1d   : > { %412 = vmatprep.subr.bf16.mxu0 %v539_v4  ;;  %v182_v9 = vunpack.c.l.bf16 %v181_v8  ;;  %s321_s11 = sshll.u32 %s167_s10, 4  ;;  %s541_s3 = smov [#allocation7]   ;;  %s660_s11 = int_to_ptr.vmem [resolvable:$true] %s321_s11 }
  0x1e   : > { %s477_s16 = scalar_lea.vmem %s660_s11, 128  ;;  %s481_s21 = sshll.u32 %s541_s3, 4  ;;  %s482_s21 = int_to_ptr.vmem [resolvable:$false] %s481_s21 }
  0x1f   : > { %v188_v11 = vsel %vm187_vm1, %v182_v9, %v570_v1  ;;  %p478_p11 = scmp.ne.s32.totalorder %s660_s11, %s477_s16  ;;  %s483_s23 = scalar_lea.vmem %s482_s21, 256 }
  0x20   : > { %413 = vmatpush3.bf16.msra.mxu0 %v471_v7  ;;  %v189_v12 = vpack.c.bf16 %v539_v4, %v188_v11  ;;  %p484_p0 = scmp.lt.s32.totalorder %s660_s11, %s482_s21  ;;  %p485_p1 = scmp.lt.s32.totalorder %s483_s23, %s477_s16 }
  0x21   : > { %414 = vmatprep.subr.bf16.mxu0 %v539_v4  ;;  %p479_p12 = pnand %p478_p11, %p610_p5 }
  0x22   : > { %192 = vst [vmem:[#allocation9] sm:$0xf] %v189_v12  ;;  %p486_p2 = por %p485_p1, %p484_p0 }
  0x23   : > { %p480_p13 = pneg %p479_p12 }
  0x24   : > { %415 = vmatpush3.bf16.msra.mxu0 %v472_v10 }
  0x25   : > { %416 = vmatprep.subr.bf16.mxu0 %v539_v4  ;;  %p487_p3 = pnand %p486_p2, %p480_p13 }
  0x28   : > { %417 = vmatpush3.bf16.msra.mxu0 %v473_v13 }
  0x29   : > { %418 = vmatprep.subr.bf16.mxu0 %v539_v4  ;;  %v194_v17 = vld [vmem:[#allocation9] sm:$0xf] }
  0x2c   : > { %419 = vmatpush3.bf16.msra.mxu0 %v474_v14 }
  0x2d   : > { %420 = vmatprep.subr.bf16.mxu0 %v539_v4 }
  0x30   : > { %421 = vmatpush3.bf16.msra.mxu0 %v475_v15 }
  0x31   : > { %422 = vmatprep.subr.bf16.mxu0 %v539_v4 }
  0x34   : > { %423 = vmatpush3.bf16.msra.mxu0 %v476_v16 }
  0x37   : > { %425 = vmatmul.mubr.bf16.vlgmr.msra.gmra.mxu0 %v194_v17 }
  0xf7   : > { %v300_v19 = vpop.f32.mrf.mxu0 }
  0xf8   : > { %v301_v20 = vadd.f32 %v386_v18, %v300_v19 }
  0xf9   : > { %v426_v21 = vpop.f32.mrf.mxu0 }
  0xfa   : > { %306 = vst [vmem:[%s167_s10] sm:$0xff] %v301_v20 }
  0xfb   : > { %v303_v22 = vpop.f32.mrf.mxu0 }
  0xfc   : > { %490 = shalt.err (!%p487_p3)
}
  0xfd   : > { %s491_s24 = scalar_lea.hbm %s658_s14, 128  ;;  %s495_s30 = scalar_lea.hbm %s703_s4, 512 }
  0xfe   : > { %p492_p4 = scmp.ne.s32.totalorder %s658_s14, %s491_s24  ;;  %p496_p9 = scmp.lt.s32.totalorder %s658_s14, %s703_s4 }
  0xff   : > { %p497_p10 = scmp.lt.s32.totalorder %s495_s30, %s491_s24 }
 0x100   : > { %p493_p7 = pnand %p492_p4, %p610_p5 }
 0x101   : > { %p498_p11 = por %p497_p10, %p496_p9 }
 0x102   : > { %p494_p8 = pneg %p493_p7 }
 0x104   : > { %p499_p12 = pnand %p498_p11, %p494_p8 }
 0x106   : > { %502 = shalt.err (!%p499_p12)
}
 0x107   : > { %428 = dma.vmem_to_hbm [thread:$0]  (%p610_p5), %s660_s11, 128, %s658_s14, %s308_s15   ;;  %v427_v23 = vpop.f32.mrf.mxu0 }
 0x108 PF: > { %p434_p13 = scmp.ge.s32.totalorder %s537_s20, 2  ;;  %s333_s7 = sand.u32 1, %s525_s17  }
 0x109   : > { %s334_s8 = scalar_lea.sflag [#allocation8], %s333_s7 }
 0x10a   : > { %p431_p0 = pnand %p434_p13, %p614_p6 }
 0x10c   : > { %p432_p1 = pneg %p431_p0 }
 0x10e   : > { %520 = dma.done.wait (%p432_p1), %s334_s8, 128  }
 0x10f   : > { %522 = vsyncadd (%p432_p1), %s334_s8, 4294967168  ;;  %p19_p2 = scmp.ge.s32.totalorder %s597_s22, 6   ;;  %s706_s17 = smov %s529_s18 }
 0x110   : > { %s707_s18 = smov %s533_s19  ;;  %s708_s19 = smov %s608_s25 }
 0x111   : > { %s709_s20 = smov %s597_s22  ;;  %21 = sbr.rel (!%p19_p2) target bundleno = 6 (0x6), region = 67 }
 0x116   :  { %339 = vsyncpa [#allocation8], 1 }
 0x117   :  { %341 = vsyncpa [#allocation8 + $0x1], 1 }

</bundles_post_ra>
